<compile_context>
chip_gen: v7x
topology: tpu7x:2x2x1
jax: 0.10.0
libtpu: 0.0.40
codegen_flags: <defaults>
</compile_context>

<pallas_src>
import functools

import jax
import jax.numpy as jnp
from jax.experimental import pallas as pl
from jax.experimental.pallas import tpu as pltpu


def _policy_kernel(
    x_ref,      # (T*B, D_in)  time-major flattened input
    h0_ref,     # (B, H)
    c0_ref,     # (B, H)
    wih_ref,    # (D_in, 4H)   transposed weight_ih_l0
    whh_ref,    # (H,   4H)    transposed weight_hh_l0
    b_ref,      # (1,   4H)    b_ih + b_hh
    w1_ref,     # (H, H)
    b1_ref,     # (1, H)
    wh_ref,     # (H, 2A)      [w2.T | w2_.T]  (fused mu/sigma head)
    bh_ref,     # (1, 2A)      [b2   | b2_  ]
    heads_ref,  # out: (T*B, 2A)  time-major fused [mu | sigma_sq]
    hn_ref,     # out: (B, H)
    cn_ref,     # out: (B, H)
    hs_buf,     # scratch: (T*B, H)  per-step hidden states, time-major
    *,
    hidden_size: int,
    seq_len: int,
    batch: int,
):
    H, T, B = hidden_size, seq_len, batch

    h = h0_ref[...]
    c = c0_ref[...]
    whh = whh_ref[...]

    # ---- Hoisted input projection: all timesteps in one MXU pass. ----------
    xp = (
        jnp.dot(x_ref[...], wih_ref[...], preferred_element_type=jnp.float32)
        + b_ref[...]
    )                                                          # (T*B, 4H)

    # ---- Serial LSTM recurrence: only h @ W_hh on the critical path. -------
    # NOTE: T is small (8); static unroll keeps full LLO scheduling visibility.
    for t in range(T):
        gates = xp[t * B:(t + 1) * B, :] + jnp.dot(
            h, whh, preferred_element_type=jnp.float32)
        sg = jax.nn.sigmoid(gates)      # one EUP pass over the full 4H lanes
        i_g = sg[:, 0 * H:1 * H]
        f_g = sg[:, 1 * H:2 * H]
        o_g = sg[:, 3 * H:4 * H]
        g_g = jnp.tanh(gates[:, 2 * H:3 * H])
        c = f_g * c + i_g * g_g
        h = o_g * jnp.tanh(c)
        # Static-offset store into scratch; not on the h->h dependency chain,
        # so it overlaps with the next step's recurrent matmul.
        hs_buf[t * B:(t + 1) * B, :] = h

    hn_ref[...] = h
    cn_ref[...] = c

    # ---- Heads hoisted out of the loop: 2 matmuls for the whole sequence. --
    h_all = hs_buf[...]                                         # (T*B, H)
    y = jnp.maximum(
        jnp.dot(h_all, w1_ref[...], preferred_element_type=jnp.float32)
        + b1_ref[...],
        0.0,
    )                                                           # (T*B, H)
    heads_ref[...] = (
        jnp.dot(y, wh_ref[...], preferred_element_type=jnp.float32)
        + bh_ref[...]
    )                                                           # (T*B, 2A)


def policy_forward(x, hidden, params):
    """x: (B, T, D_in) f32; hidden = (h0, c0) each (1, B, H).
    Returns (mu, sigma_sq, (h_n, c_n)) matching the PyTorch module."""
    h0, c0 = hidden
    B, T, D_in = x.shape
    H = params["w_hh"].shape[1]
    A = params["w2"].shape[0]

    # Time-major, flattened input: (T*B, D_in). Tiny wrapper-side transpose.
    x_tm = (
        x.astype(jnp.float32).transpose(1, 0, 2).reshape(T * B, D_in)
    )
    h0_2d = h0[0].astype(jnp.float32)                           # (B, H)
    c0_2d = c0[0].astype(jnp.float32)                           # (B, H)

    wih_t = params["w_ih"].T                                    # (D_in, 4H)
    whh_t = params["w_hh"].T                                    # (H, 4H)
    b_sum = (params["b_ih"] + params["b_hh"]).reshape(1, 4 * H)
    w1_t = params["w1"].T                                       # (H, H)
    b1 = params["b1"].reshape(1, H)
    wh = jnp.concatenate([params["w2"].T, params["w2_"].T], axis=1)   # (H, 2A)
    bh = jnp.concatenate([params["b2"], params["b2_"]]).reshape(1, 2 * A)

    vmem = pl.BlockSpec(memory_space=pltpu.MemorySpace.VMEM)
    kernel = functools.partial(
        _policy_kernel, hidden_size=H, seq_len=T, batch=B)

    flops = int(
        2 * T * B * D_in * 4 * H        # hoisted input projection
        + 2 * T * B * H * 4 * H         # recurrent h @ W_hh
        + 2 * T * B * H * H             # linear1
        + 2 * T * B * H * 2 * A         # fused mu/sigma head
    )
    transcendentals = int(T * B * 6 * H)   # sigmoid(4H) + tanh(g) + tanh(c)
    bytes_accessed = int(4 * (
        T * B * D_in + 2 * B * H                     # x, h0, c0
        + D_in * 4 * H + H * 4 * H + 4 * H           # LSTM weights + bias
        + H * H + H + H * 2 * A + 2 * A              # head weights + biases
        + T * B * 2 * A + 2 * B * H                  # outputs
    ))

    heads, h_n, c_n = pl.pallas_call(
        kernel,
        out_shape=(
            jax.ShapeDtypeStruct((T * B, 2 * A), jnp.float32),
            jax.ShapeDtypeStruct((B, H), jnp.float32),
            jax.ShapeDtypeStruct((B, H), jnp.float32),
        ),
        in_specs=[vmem] * 10,
        out_specs=(vmem, vmem, vmem),
        scratch_shapes=[pltpu.VMEM((T * B, H), jnp.float32)],
        cost_estimate=pl.CostEstimate(
            flops=flops,
            transcendentals=transcendentals,
            bytes_accessed=bytes_accessed,
        ),
    )(x_tm, h0_2d, c0_2d, wih_t, whh_t, b_sum, w1_t, b1, wh, bh)

    # Wrapper-side split/transpose of 2*B*T*A (=96) floats; fuses into XLA.
    heads_btc = heads.reshape(T, B, 2 * A).transpose(1, 0, 2)   # (B, T, 2A)
    mu = heads_btc[..., :A]
    sigma_sq = heads_btc[..., A:]

    return mu, sigma_sq, (h_n[None], c_n[None])   # hidden back to (1, B, H)


def _reference_forward(x, hidden, params):
    """Pure-JAX reference replicating torch.nn.LSTM + heads."""
    h = hidden[0][0]
    c = hidden[1][0]
    H = params["w_hh"].shape[1]
    outs = []
    for t in range(x.shape[1]):
        gates = (x[:, t] @ params["w_ih"].T + params["b_ih"]
                 + h @ params["w_hh"].T + params["b_hh"])
        i = jax.nn.sigmoid(gates[:, 0 * H:1 * H])
        f = jax.nn.sigmoid(gates[:, 1 * H:2 * H])
        g = jnp.tanh(gates[:, 2 * H:3 * H])
        o = jax.nn.sigmoid(gates[:, 3 * H:4 * H])
        c = f * c + i * g
        h = o * jnp.tanh(c)
        outs.append(h)
    out = jnp.stack(outs, axis=1)
    y = jax.nn.relu(out @ params["w1"].T + params["b1"])
    mu = y @ params["w2"].T + params["b2"]
    sig = y @ params["w2_"].T + params["b2_"]
    return mu, sig, (h[None], c[None])


def _init_params(key, num_inputs, hidden_size, num_outputs):
    """Deterministic uniform(-1/sqrt(H), 1/sqrt(H)) init (PyTorch-style)."""
    ks = jax.random.split(key, 10)
    H, D, A = hidden_size, num_inputs, num_outputs
    s = 1.0 / jnp.sqrt(H)
    u = lambda k, shape: jax.random.uniform(k, shape, jnp.float32, -s, s)
    return {
        "w_ih": u(ks[0], (4 * H, D)),
        "w_hh": u(ks[1], (4 * H, H)),
        "b_ih": u(ks[2], (4 * H,)),
        "b_hh": u(ks[3], (4 * H,)),
        "w1": u(ks[4], (H, H)),
        "b1": u(ks[5], (H,)),
        "w2": u(ks[6], (A, H)),
        "b2": u(ks[7], (A,)),
        "w2_": u(ks[8], (A, H)),
        "b2_": u(ks[9], (A,)),
    }


if __name__ == "__main__":
    B, T, D_in, H, A = 2, 8, 4, 32, 3   # batch, seq, num_inputs, hidden, action dim

    key = jax.random.PRNGKey(0)
    k_x, k_h, k_c, k_p = jax.random.split(key, 4)

    x = jax.random.normal(k_x, (B, T, D_in), jnp.float32)
    h0 = jax.random.normal(k_h, (1, B, H), jnp.float32)
    c0 = jax.random.normal(k_c, (1, B, H), jnp.float32)
    params = _init_params(k_p, D_in, H, A)

    mu, sigma_sq, (h_n, c_n) = jax.block_until_ready(
        policy_forward(x, (h0, c0), params)
    )

    # Cross-check against a pure-JAX reference of the PyTorch semantics.
    mu_r, sig_r, (hn_r, cn_r) = _reference_forward(x, (h0, c0), params)
    assert jnp.allclose(mu, mu_r, atol=1e-4, rtol=1e-4)
    assert jnp.allclose(sigma_sq, sig_r, atol=1e-4, rtol=1e-4)
    assert jnp.allclose(h_n[0], hn_r[0], atol=1e-4, rtol=1e-4)
    assert jnp.allclose(c_n[0], cn_r[0], atol=1e-4, rtol=1e-4)
    assert mu.shape == (B, T, A) and sigma_sq.shape == (B, T, A)
    assert h_n.shape == (1, B, H) and c_n.shape == (1, B, H)

    print("KERNEL_OK")
</pallas_src>

<mosaic_0001>
module attributes {stable_mosaic.version = 11 : i64} {
  func.func @_policy_kernel(%arg0: memref<16x4xf32, #tpu.memory_space<vmem>>, %arg1: memref<2x32xf32, #tpu.memory_space<vmem>>, %arg2: memref<2x32xf32, #tpu.memory_space<vmem>>, %arg3: memref<4x128xf32, #tpu.memory_space<vmem>>, %arg4: memref<32x128xf32, #tpu.memory_space<vmem>>, %arg5: memref<1x128xf32, #tpu.memory_space<vmem>>, %arg6: memref<32x32xf32, #tpu.memory_space<vmem>>, %arg7: memref<1x32xf32, #tpu.memory_space<vmem>>, %arg8: memref<32x6xf32, #tpu.memory_space<vmem>>, %arg9: memref<1x6xf32, #tpu.memory_space<vmem>>, %arg10: memref<16x6xf32, #tpu.memory_space<vmem>>, %arg11: memref<2x32xf32, #tpu.memory_space<vmem>>, %arg12: memref<2x32xf32, #tpu.memory_space<vmem>>, %arg13: memref<16x32xf32, #tpu.memory_space<vmem>>) attributes {dimension_semantics = [], scalar_prefetch = 0 : i64, scratch_operands = 1 : i64, tpu.core_type = #tpu.core_type<tc>} {
    %c0 = arith.constant 0 : index
    %c0_0 = arith.constant 0 : index
    %0 = vector.load %arg1[%c0, %c0_0] : memref<2x32xf32, #tpu.memory_space<vmem>>, vector<2x32xf32>
    %c0_1 = arith.constant 0 : index
    %c0_2 = arith.constant 0 : index
    %1 = vector.load %arg2[%c0_1, %c0_2] : memref<2x32xf32, #tpu.memory_space<vmem>>, vector<2x32xf32>
    %c0_3 = arith.constant 0 : index
    %c0_4 = arith.constant 0 : index
    %2 = vector.load %arg4[%c0_3, %c0_4] : memref<32x128xf32, #tpu.memory_space<vmem>>, vector<32x128xf32>
    %c0_5 = arith.constant 0 : index
    %c0_6 = arith.constant 0 : index
    %3 = vector.load %arg0[%c0_5, %c0_6] : memref<16x4xf32, #tpu.memory_space<vmem>>, vector<16x4xf32>
    %c0_7 = arith.constant 0 : index
    %c0_8 = arith.constant 0 : index
    %4 = vector.load %arg3[%c0_7, %c0_8] : memref<4x128xf32, #tpu.memory_space<vmem>>, vector<4x128xf32>
    %cst = arith.constant dense<0.000000e+00> : vector<16x128xf32>
    %5 = tpu.matmul %3, %4, %cst {dimension_numbers = #tpu.dot_dimension_numbers<[1], [0], [0], [1], [0, 0, 1, 1], [], []>} : vector<16x4xf32>, vector<4x128xf32>, vector<16x128xf32> -> vector<16x128xf32>
    %c0_9 = arith.constant 0 : index
    %c0_10 = arith.constant 0 : index
    %6 = vector.load %arg5[%c0_9, %c0_10] : memref<1x128xf32, #tpu.memory_space<vmem>>, vector<1x128xf32>
    %7 = vector.broadcast %6 : vector<1x128xf32> to vector<16x128xf32>
    %8 = arith.addf %5, %7 : vector<16x128xf32>
    %9 = vector.extract_strided_slice %8 {offsets = [0, 0], sizes = [2, 128], strides = [1, 1]} : vector<16x128xf32> to vector<2x128xf32>
    %cst_11 = arith.constant dense<0.000000e+00> : vector<2x128xf32>
    %10 = tpu.matmul %0, %2, %cst_11 {dimension_numbers = #tpu.dot_dimension_numbers<[1], [0], [0], [1], [0, 0, 1, 1], [], []>} : vector<2x32xf32>, vector<32x128xf32>, vector<2x128xf32> -> vector<2x128xf32>
    %11 = arith.addf %9, %10 : vector<2x128xf32>
    %12 = arith.negf %11 : vector<2x128xf32>
    %13 = math.exp %12 : vector<2x128xf32>
    %cst_12 = arith.constant 1.000000e+00 : f32
    %14 = vector.broadcast %cst_12 : f32 to vector<2x128xf32>
    %15 = arith.addf %14, %13 : vector<2x128xf32>
    %16 = arith.divf %14, %15 : vector<2x128xf32>
    %17 = vector.extract_strided_slice %16 {offsets = [0, 0], sizes = [2, 32], strides = [1, 1]} : vector<2x128xf32> to vector<2x32xf32>
    %18 = vector.extract_strided_slice %16 {offsets = [0, 32], sizes = [2, 32], strides = [1, 1]} : vector<2x128xf32> to vector<2x32xf32>
    %19 = vector.extract_strided_slice %16 {offsets = [0, 96], sizes = [2, 32], strides = [1, 1]} : vector<2x128xf32> to vector<2x32xf32>
    %20 = vector.extract_strided_slice %11 {offsets = [0, 64], sizes = [2, 32], strides = [1, 1]} : vector<2x128xf32> to vector<2x32xf32>
    %21 = math.tanh %20 : vector<2x32xf32>
    %22 = arith.mulf %18, %1 : vector<2x32xf32>
    %23 = arith.mulf %17, %21 : vector<2x32xf32>
    %24 = arith.addf %22, %23 : vector<2x32xf32>
    %25 = math.tanh %24 : vector<2x32xf32>
    %26 = arith.mulf %19, %25 : vector<2x32xf32>
    %c0_13 = arith.constant 0 : index
    %c0_14 = arith.constant 0 : index
    %27 = vector.load %arg13[%c0_13, %c0_14] : memref<16x32xf32, #tpu.memory_space<vmem>>, vector<2x32xf32>
    tpu.vector_store %arg13[%c0_13, %c0_14], %26 {strides = array<i32>} : memref<16x32xf32, #tpu.memory_space<vmem>>, vector<2x32xf32>,
    %28 = vector.extract_strided_slice %8 {offsets = [2, 0], sizes = [2, 128], strides = [1, 1]} : vector<16x128xf32> to vector<2x128xf32>
    %cst_15 = arith.constant dense<0.000000e+00> : vector<2x128xf32>
    %29 = tpu.matmul %26, %2, %cst_15 {dimension_numbers = #tpu.dot_dimension_numbers<[1], [0], [0], [1], [0, 0, 1, 1], [], []>} : vector<2x32xf32>, vector<32x128xf32>, vector<2x128xf32> -> vector<2x128xf32>
    %30 = arith.addf %28, %29 : vector<2x128xf32>
    %31 = arith.negf %30 : vector<2x128xf32>
    %32 = math.exp %31 : vector<2x128xf32>
    %cst_16 = arith.constant 1.000000e+00 : f32
    %33 = vector.broadcast %cst_16 : f32 to vector<2x128xf32>
    %34 = arith.addf %33, %32 : vector<2x128xf32>
    %35 = arith.divf %33, %34 : vector<2x128xf32>
    %36 = vector.extract_strided_slice %35 {offsets = [0, 0], sizes = [2, 32], strides = [1, 1]} : vector<2x128xf32> to vector<2x32xf32>
    %37 = vector.extract_strided_slice %35 {offsets = [0, 32], sizes = [2, 32], strides = [1, 1]} : vector<2x128xf32> to vector<2x32xf32>
    %38 = vector.extract_strided_slice %35 {offsets = [0, 96], sizes = [2, 32], strides = [1, 1]} : vector<2x128xf32> to vector<2x32xf32>
    %39 = vector.extract_strided_slice %30 {offsets = [0, 64], sizes = [2, 32], strides = [1, 1]} : vector<2x128xf32> to vector<2x32xf32>
    %40 = math.tanh %39 : vector<2x32xf32>
    %41 = arith.mulf %37, %24 : vector<2x32xf32>
    %42 = arith.mulf %36, %40 : vector<2x32xf32>
    %43 = arith.addf %41, %42 : vector<2x32xf32>
    %44 = math.tanh %43 : vector<2x32xf32>
    %45 = arith.mulf %38, %44 : vector<2x32xf32>
    %c2 = arith.constant 2 : index
    %c0_17 = arith.constant 0 : index
    %46 = vector.load %arg13[%c2, %c0_17] : memref<16x32xf32, #tpu.memory_space<vmem>>, vector<2x32xf32>
    tpu.vector_store %arg13[%c2, %c0_17], %45 {strides = array<i32>} : memref<16x32xf32, #tpu.memory_space<vmem>>, vector<2x32xf32>,
    %47 = vector.extract_strided_slice %8 {offsets = [4, 0], sizes = [2, 128], strides = [1, 1]} : vector<16x128xf32> to vector<2x128xf32>
    %cst_18 = arith.constant dense<0.000000e+00> : vector<2x128xf32>
    %48 = tpu.matmul %45, %2, %cst_18 {dimension_numbers = #tpu.dot_dimension_numbers<[1], [0], [0], [1], [0, 0, 1, 1], [], []>} : vector<2x32xf32>, vector<32x128xf32>, vector<2x128xf32> -> vector<2x128xf32>
    %49 = arith.addf %47, %48 : vector<2x128xf32>
    %50 = arith.negf %49 : vector<2x128xf32>
    %51 = math.exp %50 : vector<2x128xf32>
    %cst_19 = arith.constant 1.000000e+00 : f32
    %52 = vector.broadcast %cst_19 : f32 to vector<2x128xf32>
    %53 = arith.addf %52, %51 : vector<2x128xf32>
    %54 = arith.divf %52, %53 : vector<2x128xf32>
    %55 = vector.extract_strided_slice %54 {offsets = [0, 0], sizes = [2, 32], strides = [1, 1]} : vector<2x128xf32> to vector<2x32xf32>
    %56 = vector.extract_strided_slice %54 {offsets = [0, 32], sizes = [2, 32], strides = [1, 1]} : vector<2x128xf32> to vector<2x32xf32>
    %57 = vector.extract_strided_slice %54 {offsets = [0, 96], sizes = [2, 32], strides = [1, 1]} : vector<2x128xf32> to vector<2x32xf32>
    %58 = vector.extract_strided_slice %49 {offsets = [0, 64], sizes = [2, 32], strides = [1, 1]} : vector<2x128xf32> to vector<2x32xf32>
    %59 = math.tanh %58 : vector<2x32xf32>
    %60 = arith.mulf %56, %43 : vector<2x32xf32>
    %61 = arith.mulf %55, %59 : vector<2x32xf32>
    %62 = arith.addf %60, %61 : vector<2x32xf32>
    %63 = math.tanh %62 : vector<2x32xf32>
    %64 = arith.mulf %57, %63 : vector<2x32xf32>
    %c4 = arith.constant 4 : index
    %c0_20 = arith.constant 0 : index
    %65 = vector.load %arg13[%c4, %c0_20] : memref<16x32xf32, #tpu.memory_space<vmem>>, vector<2x32xf32>
    tpu.vector_store %arg13[%c4, %c0_20], %64 {strides = array<i32>} : memref<16x32xf32, #tpu.memory_space<vmem>>, vector<2x32xf32>,
    %66 = vector.extract_strided_slice %8 {offsets = [6, 0], sizes = [2, 128], strides = [1, 1]} : vector<16x128xf32> to vector<2x128xf32>
    %cst_21 = arith.constant dense<0.000000e+00> : vector<2x128xf32>
    %67 = tpu.matmul %64, %2, %cst_21 {dimension_numbers = #tpu.dot_dimension_numbers<[1], [0], [0], [1], [0, 0, 1, 1], [], []>} : vector<2x32xf32>, vector<32x128xf32>, vector<2x128xf32> -> vector<2x128xf32>
    %68 = arith.addf %66, %67 : vector<2x128xf32>
    %69 = arith.negf %68 : vector<2x128xf32>
    %70 = math.exp %69 : vector<2x128xf32>
    %cst_22 = arith.constant 1.000000e+00 : f32
    %71 = vector.broadcast %cst_22 : f32 to vector<2x128xf32>
    %72 = arith.addf %71, %70 : vector<2x128xf32>
    %73 = arith.divf %71, %72 : vector<2x128xf32>
    %74 = vector.extract_strided_slice %73 {offsets = [0, 0], sizes = [2, 32], strides = [1, 1]} : vector<2x128xf32> to vector<2x32xf32>
    %75 = vector.extract_strided_slice %73 {offsets = [0, 32], sizes = [2, 32], strides = [1, 1]} : vector<2x128xf32> to vector<2x32xf32>
    %76 = vector.extract_strided_slice %73 {offsets = [0, 96], sizes = [2, 32], strides = [1, 1]} : vector<2x128xf32> to vector<2x32xf32>
    %77 = vector.extract_strided_slice %68 {offsets = [0, 64], sizes = [2, 32], strides = [1, 1]} : vector<2x128xf32> to vector<2x32xf32>
    %78 = math.tanh %77 : vector<2x32xf32>
    %79 = arith.mulf %75, %62 : vector<2x32xf32>
    %80 = arith.mulf %74, %78 : vector<2x32xf32>
    %81 = arith.addf %79, %80 : vector<2x32xf32>
    %82 = math.tanh %81 : vector<2x32xf32>
    %83 = arith.mulf %76, %82 : vector<2x32xf32>
    %c6 = arith.constant 6 : index
    %c0_23 = arith.constant 0 : index
    %84 = vector.load %arg13[%c6, %c0_23] : memref<16x32xf32, #tpu.memory_space<vmem>>, vector<2x32xf32>
    tpu.vector_store %arg13[%c6, %c0_23], %83 {strides = array<i32>} : memref<16x32xf32, #tpu.memory_space<vmem>>, vector<2x32xf32>,
    %85 = vector.extract_strided_slice %8 {offsets = [8, 0], sizes = [2, 128], strides = [1, 1]} : vector<16x128xf32> to vector<2x128xf32>
    %cst_24 = arith.constant dense<0.000000e+00> : vector<2x128xf32>
    %86 = tpu.matmul %83, %2, %cst_24 {dimension_numbers = #tpu.dot_dimension_numbers<[1], [0], [0], [1], [0, 0, 1, 1], [], []>} : vector<2x32xf32>, vector<32x128xf32>, vector<2x128xf32> -> vector<2x128xf32>
    %87 = arith.addf %85, %86 : vector<2x128xf32>
    %88 = arith.negf %87 : vector<2x128xf32>
    %89 = math.exp %88 : vector<2x128xf32>
    %cst_25 = arith.constant 1.000000e+00 : f32
    %90 = vector.broadcast %cst_25 : f32 to vector<2x128xf32>
    %91 = arith.addf %90, %89 : vector<2x128xf32>
    %92 = arith.divf %90, %91 : vector<2x128xf32>
    %93 = vector.extract_strided_slice %92 {offsets = [0, 0], sizes = [2, 32], strides = [1, 1]} : vector<2x128xf32> to vector<2x32xf32>
    %94 = vector.extract_strided_slice %92 {offsets = [0, 32], sizes = [2, 32], strides = [1, 1]} : vector<2x128xf32> to vector<2x32xf32>
    %95 = vector.extract_strided_slice %92 {offsets = [0, 96], sizes = [2, 32], strides = [1, 1]} : vector<2x128xf32> to vector<2x32xf32>
    %96 = vector.extract_strided_slice %87 {offsets = [0, 64], sizes = [2, 32], strides = [1, 1]} : vector<2x128xf32> to vector<2x32xf32>
    %97 = math.tanh %96 : vector<2x32xf32>
    %98 = arith.mulf %94, %81 : vector<2x32xf32>
    %99 = arith.mulf %93, %97 : vector<2x32xf32>
    %100 = arith.addf %98, %99 : vector<2x32xf32>
    %101 = math.tanh %100 : vector<2x32xf32>
    %102 = arith.mulf %95, %101 : vector<2x32xf32>
    %c8 = arith.constant 8 : index
    %c0_26 = arith.constant 0 : index
    %103 = vector.load %arg13[%c8, %c0_26] : memref<16x32xf32, #tpu.memory_space<vmem>>, vector<2x32xf32>
    tpu.vector_store %arg13[%c8, %c0_26], %102 {strides = array<i32>} : memref<16x32xf32, #tpu.memory_space<vmem>>, vector<2x32xf32>,
    %104 = vector.extract_strided_slice %8 {offsets = [10, 0], sizes = [2, 128], strides = [1, 1]} : vector<16x128xf32> to vector<2x128xf32>
    %cst_27 = arith.constant dense<0.000000e+00> : vector<2x128xf32>
    %105 = tpu.matmul %102, %2, %cst_27 {dimension_numbers = #tpu.dot_dimension_numbers<[1], [0], [0], [1], [0, 0, 1, 1], [], []>} : vector<2x32xf32>, vector<32x128xf32>, vector<2x128xf32> -> vector<2x128xf32>
    %106 = arith.addf %104, %105 : vector<2x128xf32>
    %107 = arith.negf %106 : vector<2x128xf32>
    %108 = math.exp %107 : vector<2x128xf32>
    %cst_28 = arith.constant 1.000000e+00 : f32
    %109 = vector.broadcast %cst_28 : f32 to vector<2x128xf32>
    %110 = arith.addf %109, %108 : vector<2x128xf32>
    %111 = arith.divf %109, %110 : vector<2x128xf32>
    %112 = vector.extract_strided_slice %111 {offsets = [0, 0], sizes = [2, 32], strides = [1, 1]} : vector<2x128xf32> to vector<2x32xf32>
    %113 = vector.extract_strided_slice %111 {offsets = [0, 32], sizes = [2, 32], strides = [1, 1]} : vector<2x128xf32> to vector<2x32xf32>
    %114 = vector.extract_strided_slice %111 {offsets = [0, 96], sizes = [2, 32], strides = [1, 1]} : vector<2x128xf32> to vector<2x32xf32>
    %115 = vector.extract_strided_slice %106 {offsets = [0, 64], sizes = [2, 32], strides = [1, 1]} : vector<2x128xf32> to vector<2x32xf32>
    %116 = math.tanh %115 : vector<2x32xf32>
    %117 = arith.mulf %113, %100 : vector<2x32xf32>
    %118 = arith.mulf %112, %116 : vector<2x32xf32>
    %119 = arith.addf %117, %118 : vector<2x32xf32>
    %120 = math.tanh %119 : vector<2x32xf32>
    %121 = arith.mulf %114, %120 : vector<2x32xf32>
    %c10 = arith.constant 10 : index
    %c0_29 = arith.constant 0 : index
    %122 = vector.load %arg13[%c10, %c0_29] : memref<16x32xf32, #tpu.memory_space<vmem>>, vector<2x32xf32>
    tpu.vector_store %arg13[%c10, %c0_29], %121 {strides = array<i32>} : memref<16x32xf32, #tpu.memory_space<vmem>>, vector<2x32xf32>,
    %123 = vector.extract_strided_slice %8 {offsets = [12, 0], sizes = [2, 128], strides = [1, 1]} : vector<16x128xf32> to vector<2x128xf32>
    %cst_30 = arith.constant dense<0.000000e+00> : vector<2x128xf32>
    %124 = tpu.matmul %121, %2, %cst_30 {dimension_numbers = #tpu.dot_dimension_numbers<[1], [0], [0], [1], [0, 0, 1, 1], [], []>} : vector<2x32xf32>, vector<32x128xf32>, vector<2x128xf32> -> vector<2x128xf32>
    %125 = arith.addf %123, %124 : vector<2x128xf32>
    %126 = arith.negf %125 : vector<2x128xf32>
    %127 = math.exp %126 : vector<2x128xf32>
    %cst_31 = arith.constant 1.000000e+00 : f32
    %128 = vector.broadcast %cst_31 : f32 to vector<2x128xf32>
    %129 = arith.addf %128, %127 : vector<2x128xf32>
    %130 = arith.divf %128, %129 : vector<2x128xf32>
    %131 = vector.extract_strided_slice %130 {offsets = [0, 0], sizes = [2, 32], strides = [1, 1]} : vector<2x128xf32> to vector<2x32xf32>
    %132 = vector.extract_strided_slice %130 {offsets = [0, 32], sizes = [2, 32], strides = [1, 1]} : vector<2x128xf32> to vector<2x32xf32>
    %133 = vector.extract_strided_slice %130 {offsets = [0, 96], sizes = [2, 32], strides = [1, 1]} : vector<2x128xf32> to vector<2x32xf32>
    %134 = vector.extract_strided_slice %125 {offsets = [0, 64], sizes = [2, 32], strides = [1, 1]} : vector<2x128xf32> to vector<2x32xf32>
    %135 = math.tanh %134 : vector<2x32xf32>
    %136 = arith.mulf %132, %119 : vector<2x32xf32>
    %137 = arith.mulf %131, %135 : vector<2x32xf32>
    %138 = arith.addf %136, %137 : vector<2x32xf32>
    %139 = math.tanh %138 : vector<2x32xf32>
    %140 = arith.mulf %133, %139 : vector<2x32xf32>
    %c12 = arith.constant 12 : index
    %c0_32 = arith.constant 0 : index
    %141 = vector.load %arg13[%c12, %c0_32] : memref<16x32xf32, #tpu.memory_space<vmem>>, vector<2x32xf32>
    tpu.vector_store %arg13[%c12, %c0_32], %140 {strides = array<i32>} : memref<16x32xf32, #tpu.memory_space<vmem>>, vector<2x32xf32>,
    %142 = vector.extract_strided_slice %8 {offsets = [14, 0], sizes = [2, 128], strides = [1, 1]} : vector<16x128xf32> to vector<2x128xf32>
    %cst_33 = arith.constant dense<0.000000e+00> : vector<2x128xf32>
    %143 = tpu.matmul %140, %2, %cst_33 {dimension_numbers = #tpu.dot_dimension_numbers<[1], [0], [0], [1], [0, 0, 1, 1], [], []>} : vector<2x32xf32>, vector<32x128xf32>, vector<2x128xf32> -> vector<2x128xf32>
    %144 = arith.addf %142, %143 : vector<2x128xf32>
    %145 = arith.negf %144 : vector<2x128xf32>
    %146 = math.exp %145 : vector<2x128xf32>
    %cst_34 = arith.constant 1.000000e+00 : f32
    %147 = vector.broadcast %cst_34 : f32 to vector<2x128xf32>
    %148 = arith.addf %147, %146 : vector<2x128xf32>
    %149 = arith.divf %147, %148 : vector<2x128xf32>
    %150 = vector.extract_strided_slice %149 {offsets = [0, 0], sizes = [2, 32], strides = [1, 1]} : vector<2x128xf32> to vector<2x32xf32>
    %151 = vector.extract_strided_slice %149 {offsets = [0, 32], sizes = [2, 32], strides = [1, 1]} : vector<2x128xf32> to vector<2x32xf32>
    %152 = vector.extract_strided_slice %149 {offsets = [0, 96], sizes = [2, 32], strides = [1, 1]} : vector<2x128xf32> to vector<2x32xf32>
    %153 = vector.extract_strided_slice %144 {offsets = [0, 64], sizes = [2, 32], strides = [1, 1]} : vector<2x128xf32> to vector<2x32xf32>
    %154 = math.tanh %153 : vector<2x32xf32>
    %155 = arith.mulf %151, %138 : vector<2x32xf32>
    %156 = arith.mulf %150, %154 : vector<2x32xf32>
    %157 = arith.addf %155, %156 : vector<2x32xf32>
    %158 = math.tanh %157 : vector<2x32xf32>
    %159 = arith.mulf %152, %158 : vector<2x32xf32>
    %c14 = arith.constant 14 : index
    %c0_35 = arith.constant 0 : index
    %160 = vector.load %arg13[%c14, %c0_35] : memref<16x32xf32, #tpu.memory_space<vmem>>, vector<2x32xf32>
    tpu.vector_store %arg13[%c14, %c0_35], %159 {strides = array<i32>} : memref<16x32xf32, #tpu.memory_space<vmem>>, vector<2x32xf32>,
    %c0_36 = arith.constant 0 : index
    %c0_37 = arith.constant 0 : index
    %161 = vector.load %arg11[%c0_36, %c0_37] : memref<2x32xf32, #tpu.memory_space<vmem>>, vector<2x32xf32>
    tpu.vector_store %arg11[%c0_36, %c0_37], %159 {strides = array<i32>} : memref<2x32xf32, #tpu.memory_space<vmem>>, vector<2x32xf32>,
    %c0_38 = arith.constant 0 : index
    %c0_39 = arith.constant 0 : index
    %162 = vector.load %arg12[%c0_38, %c0_39] : memref<2x32xf32, #tpu.memory_space<vmem>>, vector<2x32xf32>
    tpu.vector_store %arg12[%c0_38, %c0_39], %157 {strides = array<i32>} : memref<2x32xf32, #tpu.memory_space<vmem>>, vector<2x32xf32>,
    %c0_40 = arith.constant 0 : index
    %c0_41 = arith.constant 0 : index
    %163 = vector.load %arg13[%c0_40, %c0_41] : memref<16x32xf32, #tpu.memory_space<vmem>>, vector<16x32xf32>
    %c0_42 = arith.constant 0 : index
    %c0_43 = arith.constant 0 : index
    %164 = vector.load %arg6[%c0_42, %c0_43] : memref<32x32xf32, #tpu.memory_space<vmem>>, vector<32x32xf32>
    %cst_44 = arith.constant dense<0.000000e+00> : vector<16x32xf32>
    %165 = tpu.matmul %163, %164, %cst_44 {dimension_numbers = #tpu.dot_dimension_numbers<[1], [0], [0], [1], [0, 0, 1, 1], [], []>} : vector<16x32xf32>, vector<32x32xf32>, vector<16x32xf32> -> vector<16x32xf32>
    %c0_45 = arith.constant 0 : index
    %c0_46 = arith.constant 0 : index
    %166 = vector.load %arg7[%c0_45, %c0_46] : memref<1x32xf32, #tpu.memory_space<vmem>>, vector<1x32xf32>
    %167 = vector.broadcast %166 : vector<1x32xf32> to vector<16x32xf32>
    %168 = arith.addf %165, %167 : vector<16x32xf32>
    %cst_47 = arith.constant 0.000000e+00 : f32
    %169 = vector.broadcast %cst_47 : f32 to vector<16x32xf32>
    %170 = arith.maximumf %168, %169 : vector<16x32xf32>
    %c0_48 = arith.constant 0 : index
    %c0_49 = arith.constant 0 : index
    %171 = vector.load %arg8[%c0_48, %c0_49] : memref<32x6xf32, #tpu.memory_space<vmem>>, vector<32x6xf32>
    %cst_50 = arith.constant dense<0.000000e+00> : vector<16x6xf32>
    %172 = tpu.matmul %170, %171, %cst_50 {dimension_numbers = #tpu.dot_dimension_numbers<[1], [0], [0], [1], [0, 0, 1, 1], [], []>} : vector<16x32xf32>, vector<32x6xf32>, vector<16x6xf32> -> vector<16x6xf32>
    %c0_51 = arith.constant 0 : index
    %c0_52 = arith.constant 0 : index
    %173 = vector.load %arg9[%c0_51, %c0_52] : memref<1x6xf32, #tpu.memory_space<vmem>>, vector<1x6xf32>
    %174 = vector.broadcast %173 : vector<1x6xf32> to vector<16x6xf32>
    %175 = arith.addf %172, %174 : vector<16x6xf32>
    %c0_53 = arith.constant 0 : index
    %c0_54 = arith.constant 0 : index
    %176 = vector.load %arg10[%c0_53, %c0_54] : memref<16x6xf32, #tpu.memory_space<vmem>>, vector<16x6xf32>
    tpu.vector_store %arg10[%c0_53, %c0_54], %175 {strides = array<i32>} : memref<16x6xf32, #tpu.memory_space<vmem>>, vector<16x6xf32>,
    return
  }
}

</mosaic_0001>

<bundles_post_ra>
// kernel: tpu_custom_call.1
= control target key start
LH: loop header
LB: loop body
LE: loop exit
PB: predicated region body
PF: predicated region fallthrough
CT: control target
= control target key end

     0   :  { %18 = vsyncpa [#allocation4], 0  ;;  %s2030_s0 = inlined_call_operand.vmem [shape: f32[16,4], index: 0, kind: input, shape index: {}]   ;;  %s2031_s1 = inlined_call_operand.vmem [shape: f32[2,32], index: 1, kind: input, shape index: {}]   ;;  %s2032_s2 = inlined_call_operand.hbm [shape: f32[2,32], index: 2, kind: input, shape index: {}]   ;;  %s2033_s3 = inlined_call_operand.hbm [shape: f32[4,128], index: 3, kind: input, shape index: {}]   ;;  %s2034_s4 = inlined_call_operand.vmem [shape: f32[32,128], index: 4, kind: input, shape index: {}]   ;;  %s2035_s5 = inlined_call_operand.vmem [shape: f32[1,128], index: 5, kind: input, shape index: {}]   ;;  %s2036_s6 = inlined_call_operand.vmem [shape: f32[32,32], index: 6, kind: input, shape index: {}]   ;;  %s2037_s7 = inlined_call_operand.vmem [shape: f32[1,32], index: 7, kind: input, shape index: {}]   ;;  %s2038_s8 = inlined_call_operand.vmem [shape: f32[32,6], index: 8, kind: input, shape index: {}]   ;;  %s2039_s9 = inlined_call_operand.vmem [shape: f32[1,6], index: 9, kind: input, shape index: {}]   ;;  %s2040_s10 = inlined_call_operand.vmem [shape: f32[16,6], index: 10, kind: output, shape index: {0}]   ;;  %s2041_s11 = inlined_call_operand.hbm [shape: f32[2,32], index: 11, kind: output, shape index: {1}]   ;;  %s2042_s12 = inlined_call_operand.hbm [shape: f32[2,32], index: 12, kind: output, shape index: {2}]  }
   0x1   :  { %19 = vsyncpa [#allocation7], 0 }
   0x2   :  { %20 = vsyncpa [#allocation5], 0 }
   0x3   :  { %21 = vsyncpa [#allocation10], 0  ;;  %s1707_s21 = smov [#allocation3]   ;;  %s1708_s23 = smov [#allocation6]  }
   0x4   :  { %s32_s22 = sshll.u32 %s1707_s21, 4  ;;  %s42_s24 = sshll.u32 %s1708_s23, 4  ;;  %s33_s22 = int_to_ptr.vmem [resolvable:$true] %s32_s22  ;;  %s43_s24 = int_to_ptr.vmem [resolvable:$true] %s42_s24 }
   0x5   :  { %s1611_s27 = scalar_lea.hbm %s2032_s2, 32 }
   0x6   :  { %p1612_p0 = scmp.ne.s32.totalorder %s2032_s2, %s1611_s27  ;;  %p1615_p1 = scmp.lt.u32.totalorder %s1611_s27, %s2032_s2 }
   0x8   :  { %p1617_p2 = pnand %p1615_p1, %p1612_p0 }
   0xa   :  { %1620 = shalt.err (!%p1617_p2)
}
   0xb   :  { %s1621_s14 = scalar_lea.vmem %s33_s22, 32  ;;  %p1626_p4 = scmp.lt.s32.totalorder %s33_s22, %s33_s22 }
   0xc   :  { %p1622_p3 = scmp.ne.s32.totalorder %s33_s22, %s1621_s14  ;;  %p1627_p5 = scmp.lt.s32.totalorder %s1621_s14, %s1621_s14 }
   0xe   :  { %p1628_p6 = por %p1627_p5, %p1626_p4 }
  0x10   :  { %p1629_p7 = pnand %p1628_p6, %p1622_p3 }
  0x12   :  { %1632 = shalt.err (!%p1629_p7)
}
  0x13   :  { %35 = dma.hbm_to_vmem [thread:$0]  %s2032_s2, 32, %s33_s22, [#allocation4]  }
  0x14   :  { %s1633_s19 = scalar_lea.hbm %s2033_s3, 64 }
  0x15   :  { %p1634_p8 = scmp.ne.s32.totalorder %s2033_s3, %s1633_s19  ;;  %p1637_p9 = scmp.lt.u32.totalorder %s1633_s19, %s2033_s3 }
  0x17   :  { %p1639_p10 = pnand %p1637_p9, %p1634_p8 }
  0x19   :  { %1642 = shalt.err (!%p1639_p10)
}
  0x1a   :  { %s1643_s26 = scalar_lea.vmem %s43_s24, 64  ;;  %p1648_p12 = scmp.lt.s32.totalorder %s43_s24, %s43_s24 }
  0x1b   :  { %p1644_p11 = scmp.ne.s32.totalorder %s43_s24, %s1643_s26  ;;  %p1649_p13 = scmp.lt.s32.totalorder %s1643_s26, %s1643_s26 }
  0x1d   :  { %p1650_p0 = por %p1649_p13, %p1648_p12 }
  0x1f   :  { %p1651_p1 = pnand %p1650_p0, %p1644_p11 }
  0x21   :  { %1654 = shalt.err (!%p1651_p1)
}
  0x22   :  { %45 = dma.hbm_to_vmem [thread:$0]  %s2033_s3, 64, %s43_s24, [#allocation7]  }
  0x23   :  { %1699 = dma.done.wait [#allocation4], 32  }
  0x24   :  { %1700 = vsyncadd [#allocation4], 4294967264 }
  0x25   :  { %1701 = dma.done.wait [#allocation7], 64  }
  0x26   :  { %1702 = vsyncadd [#allocation7], 4294967232  ;;  %v1709_v0 = vmov 0.0|0.0   ;;  %vm1710_vm0 = vmmov 0   ;;  %v1711_v1 = vmov 0.0   ;;  %vm87_vm1 = vcmask 1043456  }
  0x27   :  { %1473 = vmatprep.subr.bf16.mxu1 %v1709_v0  ;;  %1371 = vmatprep.mubr.msk.f32.mxu1 %vm1710_vm0, %v1711_v1  ;;  %vm80_vm2 = vcmask 31744   ;;  %v66_v2 = vld [vmem:[%s2034_s4] sm:$0xff]  ;;  %v67_v3 = vld [vmem:[%s2034_s4 + $0x8] sm:$0xff]  ;;  %v72_v4 = vld [vmem:[#allocation6] sm:$0xf]  ;;  %vm166_vm3 = vcmask 261120  }
  0x28   :  { %v1815_v5 = vpack.c.bf16 %v67_v3, %v66_v2  ;;  %1358 = vmatprep.subr.msk.mxu0 %vm87_vm1, %v72_v4  ;;  %v70_v6 = vld [vmem:[%s2030_s0] sm:$0xff]  ;;  %v71_v7 = vld [vmem:[%s2030_s0 + $0x8] sm:$0xff]  ;;  %v68_v8 = vld [vmem:[%s2034_s4 + $0x10] sm:$0xff]  ;;  %s1712_s20 = smov 64   ;;  %s1713_s21 = smov 32   ;;  %vm273_vm4 = vcmask 254976  }
  0x29   :  { %1359 = vmatpush3.msk.msra.mxu0 %vm87_vm1, %v72_v4  ;;  %1360 = vmatprep.mubr.msk.f32.mxu0 %vm80_vm2, %v70_v6  ;;  %v69_v9 = vld [vmem:[%s2034_s4 + $0x18] sm:$0xff]  ;;  %v64_v11 = vld [vmem:[%s2031_s1] sm:$0x3]  ;;  %vm382_vm5 = vcmask 257026   ;;  %vm606_vm6 = vcmask 261126   ;;  %vm494_vm7 = vcmask 259076  }
  0x2a   :  { %1475 = vmatpush3.bf16.msra.mxu1 %v1815_v5  ;;  %1361 = vmatmul.mubr.msk.f32.vlgmr.msra.gmra.mrb[0].mxu0 %vm80_vm2, %v71_v7  ;;  %v1830_v10 = vpack.c.bf16 %v69_v9, %v68_v8  ;;  %v1277_v12 = vld [vmem:[%s2035_s5] ss:$0 sm:$0xff]  ;;  %v65_v21 = vld [vmem:[#allocation3] sm:$0x3]  ;;  %s1714_s5 = smov 96   ;;  %s1715_s0 = smov [#allocation8]  }
  0x2b   :  { %1476 = vmatprep.subr.bf16.mxu1 %v1709_v0  ;;  %1479 = vmatprep.subr.bf16.mxu0 %v1709_v0  ;;  %s1251_s4 = sshll.u32 %s1715_s0, 4  ;;  %s1252_s4 = int_to_ptr.vmem [resolvable:$true] %s1251_s4 }
  0x2c   :  { %1481 = vmatpush3.bf16.msra.mxu0 %v1815_v5  ;;  %1382 = vmatprep.mubr.msk.f32.mxu0 %vm1710_vm0, %v1711_v1  ;;  %s1655_s19 = scalar_lea.vmem %s1252_s4, 32  ;;  %p1660_p3 = scmp.lt.s32.totalorder %s1252_s4, %s1252_s4 }
  0x2d   :  { %1482 = vmatprep.subr.bf16.mxu0 %v1709_v0  ;;  %p1656_p2 = scmp.ne.s32.totalorder %s1252_s4, %s1655_s19  ;;  %p1661_p4 = scmp.lt.s32.totalorder %s1655_s19, %s1655_s19 }
  0x2e   :  { %1478 = vmatpush3.bf16.msra.mxu1 %v1830_v10 }
  0x2f   :  { %1485 = vmatprep.subr.bf16.mxu1 %v1709_v0  ;;  %p1662_p5 = por %p1661_p4, %p1660_p3 }
  0x30   :  { %1484 = vmatpush3.bf16.msra.mxu0 %v1830_v10 }
  0x31   :  { %1372 = vmatmul.mubr.msk.f32.vlgmr.msra.gmra.mrb[0].mxu1 %vm166_vm3, %v64_v11  ;;  %1491 = vmatprep.subr.bf16.mxu0 %v1709_v0  ;;  %p1663_p6 = pnand %p1662_p5, %p1656_p2 }
  0x32   :  { %1487 = vmatpush3.bf16.msra.mxu1 %v1815_v5  ;;  %1393 = vmatprep.mubr.msk.f32.mxu1 %vm1710_vm0, %v1711_v1 }
  0x33   :  { %1488 = vmatprep.subr.bf16.mxu1 %v1709_v0 }
  0x36   :  { %1490 = vmatpush3.bf16.msra.mxu1 %v1830_v10 }
  0x37   :  { %1497 = vmatprep.subr.bf16.mxu1 %v1709_v0 }
  0xfd   :  { %v1362_v13 = vpop.f32.mrb[0].mxu0 }
  0xfe   :  { %v1855_v14 = vadd.f32 %v1362_v13, %v1277_v12  ;;  %v157_v15 = vpop.f32.mrb[1].mxu0 }
  0xff   :  { %v1857_v16 = vadd.f32 %v1277_v12, %v157_v15 }
 0x104   :  { %v236_v17 = vpop.f32.mrb[0].mxu1 }
 0x105   :  { %v240_v18 = vadd.f32 %v236_v17, %v1857_v16  ;;  %v1373_v19 = vpop.f32.mrb[1].mxu1 }
 0x107   :  { %1547 = vtanh.f32 %v240_v18  ;;  %v1282_v22 = vmul.f32 -1.442695, %v240_v18 }
 0x109   :  { %1549 = vpow2.f32 %v1282_v22 }
 0x111   :  { %v1548_v20 = vpop.eup %1547 }
 0x112   :  { %254 = vrot.lane.b32.xlu0 %v1548_v20, %s1712_s20 }
 0x113   :  { %v1550_v23 = vpop.eup %1549 }
 0x114   :  { %v244_v24 = vadd.f32 1.0, %v1550_v23 }
 0x116   :  { %249 = vrot.lane.b32.xlu0 %v65_v21, %s1713_s21  ;;  %1551 = vrcp.f32 %v244_v24 }
 0x120   :  { %v1552_v25 = vpop.eup %1551 }
 0x184   :  { %v255_v26 = vpop.permute.xlu0 %254 }
 0x185   :  { %v257_v27 = vmul.f32 %v1552_v25, %v255_v26 }
 0x187   :  { %259 = vrot.lane.b32.xlu1 %v257_v27, %s1713_s21 }
 0x188   :  { %v250_v28 = vpop.permute.xlu0 %249 }
 0x189   :  { %v252_v29 = vmul.f32 %v1552_v25, %v250_v28 }
 0x1f9   :  { %v260_v30 = vpop.permute.xlu1 %259 }
 0x1fa   :  { %v262_v31 = vadd.f32 %v260_v30, %v252_v29 }
 0x1fc   :  { %1553 = vtanh.f32 %v262_v31  ;;  %v359_v47 = vrot.slane %v262_v31, 6 }
 0x206   :  { %v1554_v32 = vpop.eup %1553 }
 0x207   :  { %265 = vrot.lane.b32.xlu1 %v1554_v32, %s1712_s20 }
 0x279   :  { %v266_v33 = vpop.permute.xlu1 %265 }
 0x27a   :  { %v268_v34 = vmul.f32 %v1552_v25, %v266_v33 }
 0x27c   :  { %270 = vrot.lane.b32.xlu0 %v268_v34, %s1713_s21 }
 0x2ee   :  { %v271_v35 = vpop.permute.xlu0 %270 }
 0x2ef   :  { %274 = vst.msk [vmem:[#allocation2] sm:$0x3] %vm273_vm4, %v271_v35  ;;  %1383 = vmatmul.mubr.msk.f32.vlgmr.msra.gmra.mrb[2].mxu0 %vm166_vm3, %v271_v35 }
 0x2f0   :  { %1493 = vmatpush3.bf16.msra.mxu0 %v1815_v5  ;;  %1404 = vmatprep.mubr.msk.f32.mxu0 %vm1710_vm0, %v1711_v1 }
 0x2f1   :  { %1494 = vmatprep.subr.bf16.mxu0 %v1709_v0 }
 0x2f4   :  { %1496 = vmatpush3.bf16.msra.mxu0 %v1830_v10 }
 0x2f5   :  { %1503 = vmatprep.subr.bf16.mxu0 %v1709_v0 }
 0x3c2   :  { %v343_v36 = vpop.f32.mrb[2].mxu0 }
 0x3c3   :  { %v348_v37 = vrot.slane %v343_v36, 6  ;;  %v1384_v38 = vpop.f32.mrb[3].mxu0 }
 0x3c5   :  { %v350_v39 = vadd.f32 %v348_v37, %v1857_v16 }
 0x3c7   :  { %1555 = vtanh.f32 %v350_v39  ;;  %v1284_v41 = vmul.f32 -1.442695, %v350_v39 }
 0x3c9   :  { %1557 = vpow2.f32 %v1284_v41 }
 0x3d1   :  { %v1556_v40 = vpop.eup %1555 }
 0x3d2   :  { %363 = vrot.lane.b32.xlu1 %v1556_v40, %s1712_s20 }
 0x3d3   :  { %v1558_v42 = vpop.eup %1557 }
 0x3d4   :  { %v354_v43 = vadd.f32 1.0, %v1558_v42 }
 0x3d6   :  { %1559 = vrcp.f32 %v354_v43 }
 0x3e0   :  { %v1560_v44 = vpop.eup %1559 }
 0x3e1   :  { %v361_v48 = vmul.f32 %v1560_v44, %v359_v47 }
 0x444   :  { %v364_v45 = vpop.permute.xlu1 %363 }
 0x445   :  { %v366_v46 = vmul.f32 %v1560_v44, %v364_v45 }
 0x447   :  { %368 = vrot.lane.b32.xlu0 %v366_v46, %s1713_s21 }
 0x4b9   :  { %v369_v49 = vpop.permute.xlu0 %368 }
 0x4ba   :  { %v371_v50 = vadd.f32 %v369_v49, %v361_v48 }
 0x4bc   :  { %1561 = vtanh.f32 %v371_v50  ;;  %v471_v6 = vrot.slane %v371_v50, 6 }
 0x4c6   :  { %v1562_v51 = vpop.eup %1561 }
 0x4c7   :  { %374 = vrot.lane.b32.xlu1 %v1562_v51, %s1712_s20 }
 0x539   :  { %v375_v52 = vpop.permute.xlu1 %374 }
 0x53a   :  { %v1877_v53 = vmul.f32 %v1560_v44, %v375_v52 }
 0x53c   :  { %v384_v54 = vrot.slane %v1877_v53, 2 }
 0x53e   :  { %385 = vrot.lane.b32.xlu0 %v384_v54, %s1713_s21 }
 0x5b0   :  { %v386_v55 = vpop.permute.xlu0 %385 }
 0x5b1   :  { %1394 = vmatmul.mubr.msk.f32.vlgmr.msra.gmra.mrb[2].mxu1 %vm166_vm3, %v386_v55 }
 0x5b2   :  { %1499 = vmatpush3.bf16.msra.mxu1 %v1815_v5  ;;  %1415 = vmatprep.mubr.msk.f32.mxu1 %vm1710_vm0, %v1711_v1 }
 0x5b3   :  { %1500 = vmatprep.subr.bf16.mxu1 %v1709_v0 }
 0x5b6   :  { %1502 = vmatpush3.bf16.msra.mxu1 %v1830_v10 }
 0x5b7   :  { %1509 = vmatprep.subr.bf16.mxu1 %v1709_v0 }
 0x684   :  { %v455_v56 = vpop.f32.mrb[2].mxu1 }
 0x685   :  { %v460_v57 = vrot.slane %v455_v56, 4  ;;  %v1395_v58 = vpop.f32.mrb[3].mxu1 }
 0x687   :  { %v462_v59 = vadd.f32 %v460_v57, %v1857_v16 }
 0x689   :  { %1563 = vtanh.f32 %v462_v59  ;;  %v1286_v61 = vmul.f32 -1.442695, %v462_v59 }
 0x68b   :  { %1565 = vpow2.f32 %v1286_v61 }
 0x693   :  { %v1564_v60 = vpop.eup %1563 }
 0x694   :  { %475 = vrot.lane.b32.xlu1 %v1564_v60, %s1712_s20 }
 0x695   :  { %v1566_v62 = vpop.eup %1565 }
 0x696   :  { %v466_v63 = vadd.f32 1.0, %v1566_v62 }
 0x698   :  { %1567 = vrcp.f32 %v466_v63 }
 0x6a2   :  { %v1568_v2 = vpop.eup %1567 }
 0x6a3   :  { %v473_v7 = vmul.f32 %v1568_v2, %v471_v6 }
 0x706   :  { %v476_v3 = vpop.permute.xlu1 %475 }
 0x707   :  { %v478_v4 = vmul.f32 %v1568_v2, %v476_v3 }
 0x709   :  { %480 = vrot.lane.b32.xlu0 %v478_v4, %s1713_s21 }
 0x77b   :  { %v481_v8 = vpop.permute.xlu0 %480 }
 0x77c   :  { %v483_v9 = vadd.f32 %v481_v8, %v473_v7 }
 0x77e   :  { %1569 = vtanh.f32 %v483_v9  ;;  %v583_v29 = vrot.slane %v483_v9, 6 }
 0x788   :  { %v1570_v11 = vpop.eup %1569 }
 0x789   :  { %486 = vrot.lane.b32.xlu1 %v1570_v11, %s1712_s20 }
 0x7fb   :  { %v487_v12 = vpop.permute.xlu1 %486 }
 0x7fc   :  { %v1892_v13 = vmul.f32 %v1568_v2, %v487_v12 }
 0x7fe   :  { %v496_v15 = vrot.slane %v1892_v13, 4 }
 0x800   :  { %497 = vrot.lane.b32.xlu0 %v496_v15, %s1713_s21 }
 0x872   :  { %v498_v17 = vpop.permute.xlu0 %497 }
 0x873   :  { %1405 = vmatmul.mubr.msk.f32.vlgmr.msra.gmra.mrb[4].mxu0 %vm166_vm3, %v498_v17 }
 0x874   :  { %1505 = vmatpush3.bf16.msra.mxu0 %v1815_v5  ;;  %1426 = vmatprep.mubr.msk.f32.mxu0 %vm1710_vm0, %v1711_v1 }
 0x875   :  { %1506 = vmatprep.subr.bf16.mxu0 %v1709_v0 }
 0x878   :  { %1508 = vmatpush3.bf16.msra.mxu0 %v1830_v10 }
 0x879   :  { %1515 = vmatprep.subr.bf16.mxu0 %v1709_v0 }
 0x946   :  { %v567_v18 = vpop.f32.mrb[4].mxu0 }
 0x947   :  { %v572_v19 = vrot.slane %v567_v18, 2  ;;  %v1406_v20 = vpop.f32.mrb[5].mxu0 }
 0x949   :  { %v574_v21 = vadd.f32 %v572_v19, %v1857_v16 }
 0x94b   :  { %1571 = vtanh.f32 %v574_v21  ;;  %v1288_v23 = vmul.f32 -1.442695, %v574_v21 }
 0x94d   :  { %1573 = vpow2.f32 %v1288_v23 }
 0x955   :  { %v1572_v22 = vpop.eup %1571 }
 0x956   :  { %587 = vrot.lane.b32.xlu1 %v1572_v22, %s1712_s20 }
 0x957   :  { %v1574_v24 = vpop.eup %1573 }
 0x958   :  { %v578_v25 = vadd.f32 1.0, %v1574_v24 }
 0x95a   :  { %1575 = vrcp.f32 %v578_v25 }
 0x964   :  { %v1576_v26 = vpop.eup %1575 }
 0x965   :  { %v585_v30 = vmul.f32 %v1576_v26, %v583_v29 }
 0x9c8   :  { %v588_v27 = vpop.permute.xlu1 %587 }
 0x9c9   :  { %v590_v28 = vmul.f32 %v1576_v26, %v588_v27 }
 0x9cb   :  { %592 = vrot.lane.b32.xlu0 %v590_v28, %s1713_s21 }
 0xa3d   :  { %v593_v31 = vpop.permute.xlu0 %592 }
 0xa3e   :  { %v595_v32 = vadd.f32 %v593_v31, %v585_v30 }
 0xa40   :  { %1577 = vtanh.f32 %v595_v32  ;;  %v692_v47 = vrot.slane %v595_v32, 6 }
 0xa4a   :  { %v1578_v16 = vpop.eup %1577 }
 0xa4b   :  { %598 = vrot.lane.b32.xlu1 %v1578_v16, %s1712_s20 }
 0xabd   :  { %v599_v33 = vpop.permute.xlu1 %598 }
 0xabe   :  { %v1907_v34 = vmul.f32 %v1576_v26, %v599_v33 }
 0xac0   :  { %v608_v35 = vrot.slane %v1907_v34, 6 }
 0xac2   :  { %609 = vrot.lane.b32.xlu0 %v608_v35, %s1713_s21 }
 0xb34   :  { %v610_v36 = vpop.permute.xlu0 %609 }
 0xb35   :  { %1416 = vmatmul.mubr.msk.f32.vlgmr.msra.gmra.mrb[4].mxu1 %vm166_vm3, %v610_v36 }
 0xb36   :  { %1511 = vmatpush3.bf16.msra.mxu1 %v1815_v5  ;;  %1437 = vmatprep.mubr.msk.f32.mxu1 %vm1710_vm0, %v1711_v1 }
 0xb37   :  { %1512 = vmatprep.subr.bf16.mxu1 %v1709_v0 }
 0xb3a   :  { %1514 = vmatpush3.bf16.msra.mxu1 %v1830_v10 }
 0xc08   :  { %v679_v37 = vpop.f32.mrb[4].mxu1 }
 0xc09   :  { %v683_v38 = vadd.f32 %v679_v37, %v1855_v14  ;;  %v1417_v39 = vpop.f32.mrb[5].mxu1 }
 0xc0b   :  { %1579 = vtanh.f32 %v683_v38  ;;  %v1290_v41 = vmul.f32 -1.442695, %v683_v38 }
 0xc0d   :  { %1581 = vpow2.f32 %v1290_v41 }
 0xc15   :  { %v1580_v40 = vpop.eup %1579 }
 0xc16   :  { %696 = vrot.lane.b32.xlu1 %v1580_v40, %s1712_s20 }
 0xc17   :  { %v1582_v42 = vpop.eup %1581 }
 0xc18   :  { %v687_v43 = vadd.f32 1.0, %v1582_v42 }
 0xc1a   :  { %1583 = vrcp.f32 %v687_v43 }
 0xc24   :  { %v1584_v44 = vpop.eup %1583 }
 0xc25   :  { %v694_v48 = vmul.f32 %v1584_v44, %v692_v47 }
 0xc88   :  { %v697_v45 = vpop.permute.xlu1 %696 }
 0xc89   :  { %v699_v46 = vmul.f32 %v1584_v44, %v697_v45 }
 0xc8b   :  { %701 = vrot.lane.b32.xlu0 %v699_v46, %s1713_s21 }
 0xcfd   :  { %v702_v49 = vpop.permute.xlu0 %701 }
 0xcfe   :  { %v704_v50 = vadd.f32 %v702_v49, %v694_v48 }
 0xd00   :  { %1585 = vtanh.f32 %v704_v50 }
 0xd0a   :  { %v1586_v51 = vpop.eup %1585 }
 0xd0b   :  { %707 = vrot.lane.b32.xlu1 %v1586_v51, %s1712_s20  ;;  %v1054_v51 = vld [vmem:[%s2036_s6] sm:$0xff] }
 0xd7d   :  { %v708_v52 = vpop.permute.xlu1 %707 }
 0xd7e   :  { %v710_v54 = vmul.f32 %v1584_v44, %v708_v52  ;;  %v1055_v52 = vld [vmem:[%s2036_s6 + $0x8] sm:$0xff] }
 0xd80   :  { %712 = vrot.lane.b32.xlu0 %v710_v54, %s1713_s21  ;;  %v1521_v54 = vpack.c.bf16 %v1055_v52, %v1054_v51 }
 0xd82   :  { %1522 = vmatprep.subr.bf16.mxu1 %v1521_v54 }
 0xdf2   :  { %v713_v55 = vpop.permute.xlu0 %712 }
 0xdf3   :  { %715 = vst.msk [vmem:[#allocation2 + $0x8] sm:$0x3] %vm273_vm4, %v713_v55  ;;  %1427 = vmatmul.mubr.msk.f32.vlgmr.msra.gmra.mrb[6].mxu0 %vm166_vm3, %v713_v55 }
 0xdf4   :  { %1517 = vmatpush3.bf16.msra.mxu0 %v1815_v5  ;;  %1448 = vmatprep.mubr.msk.f32.mxu0 %vm1710_vm0, %v1711_v1 }
 0xdf5   :  { %1518 = vmatprep.subr.bf16.mxu0 %v1709_v0  ;;  %v800_v0 = vrot.slane %v704_v50, 6 }
 0xdf8   :  { %1520 = vmatpush3.bf16.msra.mxu0 %v1830_v10 }
 0xec6   :  { %v784_v56 = vpop.f32.mrb[6].mxu0 }
 0xec7   :  { %v789_v57 = vrot.slane %v784_v56, 6  ;;  %v1428_v58 = vpop.f32.mrb[7].mxu0  ;;  %v1057_v56 = vld [vmem:[%s2036_s6 + $0x18] sm:$0xff] }
 0xec8   :  { %v1148_v58 = vld [vmem:[%s2038_s8] sm:$0xff] }
 0xec9   :  { %v791_v59 = vadd.f32 %v789_v57, %v1855_v14 }
 0xecb   :  { %1587 = vtanh.f32 %v791_v59  ;;  %v1292_v61 = vmul.f32 -1.442695, %v791_v59  ;;  %v1149_v59 = vld [vmem:[%s2038_s8 + $0x8] sm:$0xff] }
 0xecd   :  { %1589 = vpow2.f32 %v1292_v61 }
 0xed5   :  { %v1588_v60 = vpop.eup %1587 }
 0xed6   :  { %804 = vrot.lane.b32.xlu1 %v1588_v60, %s1712_s20  ;;  %v1529_v60 = vpack.c.bf16 %v1149_v59, %v1148_v58 }
 0xed7   :  { %v1590_v62 = vpop.eup %1589 }
 0xed8   :  { %v795_v5 = vadd.f32 1.0, %v1590_v62  ;;  %1530 = vmatprep.subr.bf16.mxu0 %v1529_v60 }
 0xeda   :  { %1591 = vrcp.f32 %v795_v5 }
 0xee4   :  { %v1592_v63 = vpop.eup %1591 }
 0xee5   :  { %v802_v10 = vmul.f32 %v1592_v63, %v800_v0 }
 0xf48   :  { %v805_v1 = vpop.permute.xlu1 %804 }
 0xf49   :  { %v807_v2 = vmul.f32 %v1592_v63, %v805_v1 }
 0xf4b   :  { %809 = vrot.lane.b32.xlu0 %v807_v2, %s1713_s21 }
 0xfbd   :  { %v810_v3 = vpop.permute.xlu0 %809 }
 0xfbe   :  { %v812_v4 = vadd.f32 %v810_v3, %v802_v10  ;;  %v1150_v10 = vld [vmem:[%s2038_s8 + $0x10] sm:$0xff]  ;;  %v1151_v3 = vld [vmem:[%s2038_s8 + $0x18] sm:$0xff]  ;;  %s1716_s8 = smov [#allocation9]  }
 0xfbf   :  { %s1261_s1 = sshll.u32 %s1716_s8, 4  ;;  %s1262_s1 = int_to_ptr.vmem [resolvable:$true] %s1261_s1 }
 0xfc0   :  { %1593 = vtanh.f32 %v812_v4  ;;  %v911_v26 = vrot.slane %v812_v4, 6  ;;  %v1533_v4 = vpack.c.bf16 %v1151_v3, %v1150_v10 }
 0xfca   :  { %v1594_v6 = vpop.eup %1593 }
 0xfcb   :  { %815 = vrot.lane.b32.xlu1 %v1594_v6, %s1712_s20  ;;  %v1297_v6 = vld [vmem:[%s2037_s7] ss:$0 sm:$0xff] }
0x103d   :  { %v816_v7 = vpop.permute.xlu1 %815 }
0x103e   :  { %v1933_v8 = vmul.f32 %v1592_v63, %v816_v7 }
0x1040   :  { %v824_v9 = vrot.slane %v1933_v8, 2 }
0x1042   :  { %825 = vrot.lane.b32.xlu0 %v824_v9, %s1713_s21 }
0x10b4   :  { %v826_v11 = vpop.permute.xlu0 %825 }
0x10b5   :  { %1438 = vmatmul.mubr.msk.f32.vlgmr.msra.gmra.mrb[6].mxu1 %vm166_vm3, %v826_v11 }
0x10b6   :  { %1524 = vmatpush3.bf16.msra.mxu1 %v1521_v54 }
0x1188   :  { %v895_v12 = vpop.f32.mrb[6].mxu1 }
0x1189   :  { %v900_v15 = vrot.slane %v895_v12, 4  ;;  %v1439_v17 = vpop.f32.mrb[7].mxu1 }
0x118b   :  { %v902_v18 = vadd.f32 %v900_v15, %v1855_v14 }
0x118d   :  { %1595 = vtanh.f32 %v902_v18  ;;  %v1294_v20 = vmul.f32 -1.442695, %v902_v18 }
0x118f   :  { %1597 = vpow2.f32 %v1294_v20 }
0x1197   :  { %v1596_v19 = vpop.eup %1595 }
0x1198   :  { %915 = vrot.lane.b32.xlu1 %v1596_v19, %s1712_s20 }
0x1199   :  { %v1598_v21 = vpop.eup %1597 }
0x119a   :  { %v906_v22 = vadd.f32 1.0, %v1598_v21 }
0x119c   :  { %1599 = vrcp.f32 %v906_v22 }
0x11a6   :  { %v1600_v23 = vpop.eup %1599 }
0x11a7   :  { %v913_v27 = vmul.f32 %v1600_v23, %v911_v26 }
0x120a   :  { %v916_v24 = vpop.permute.xlu1 %915 }
0x120b   :  { %v918_v25 = vmul.f32 %v1600_v23, %v916_v24 }
0x120d   :  { %920 = vrot.lane.b32.xlu0 %v918_v25, %s1713_s21 }
0x127f   :  { %v921_v28 = vpop.permute.xlu0 %920 }
0x1280   :  { %v923_v29 = vadd.f32 %v921_v28, %v913_v27 }
0x1282   :  { %1601 = vtanh.f32 %v923_v29 }
0x128c   :  { %v1602_v30 = vpop.eup %1601 }
0x128d   :  { %926 = vrot.lane.b32.xlu1 %v1602_v30, %s1712_s20 }
0x12ff   :  { %v927_v31 = vpop.permute.xlu1 %926 }
0x1300   :  { %v929_v32 = vmul.f32 %v1600_v23, %v927_v31 }
0x1302   :  { %v935_v16 = vrot.slane %v929_v32, 4 }
0x1304   :  { %936 = vrot.lane.b32.xlu0 %v935_v16, %s1713_s21 }
0x1376   :  { %v937_v33 = vpop.permute.xlu0 %936 }
0x1377   :  { %1449 = vmatmul.mubr.msk.f32.vlgmr.msra.gmra.mrb[8].mxu0 %vm166_vm3, %v937_v33 }
0x1378   :  { %1532 = vmatpush3.bf16.msra.mxu0 %v1529_v60 }
0x1379   :  { %1534 = vmatprep.subr.bf16.mxu0 %v1533_v4 }
0x137c   :  { %1536 = vmatpush3.bf16.msra.mxu0 %v1533_v4 }
0x144a   :  { %v1006_v35 = vpop.f32.mrb[8].mxu0 }
0x144b   :  { %v1011_v36 = vrot.slane %v1006_v35, 2  ;;  %v1450_v37 = vpop.f32.mrb[9].mxu0 }
0x144d   :  { %v1013_v38 = vadd.f32 %v1011_v36, %v1855_v14  ;;  %v1022_v14 = vrot.slane %v923_v29, 6 }
0x144f   :  { %1603 = vtanh.f32 %v1013_v38  ;;  %v1296_v40 = vmul.f32 -1.442695, %v1013_v38 }
0x1451   :  { %1605 = vpow2.f32 %v1296_v40 }
0x1459   :  { %v1604_v39 = vpop.eup %1603 }
0x145a   :  { %1026 = vrot.lane.b32.xlu1 %v1604_v39, %s1712_s20 }
0x145b   :  { %v1606_v41 = vpop.eup %1605 }
0x145c   :  { %v1017_v42 = vadd.f32 1.0, %v1606_v41 }
0x145e   :  { %1607 = vrcp.f32 %v1017_v42 }
0x1468   :  { %v1608_v43 = vpop.eup %1607 }
0x1469   :  { %v1024_v46 = vmul.f32 %v1608_v43, %v1022_v14 }
0x14cc   :  { %v1027_v44 = vpop.permute.xlu1 %1026 }
0x14cd   :  { %v1029_v45 = vmul.f32 %v1608_v43, %v1027_v44 }
0x14cf   :  { %1031 = vrot.lane.b32.xlu0 %v1029_v45, %s1713_s21 }
0x14d3   :  { %379 = vrot.lane.b32.xlu0 %v1877_v53, %s1713_s21 }
0x14d7   :  { %603 = vrot.lane.b32.xlu0 %v1907_v34, %s1713_s21 }
0x14db   :  { %931 = vrot.lane.b32.xlu0 %v929_v32, %s1713_s21 }
0x1541   :  { %v1032_v47 = vpop.permute.xlu0 %1031 }
0x1542   :  { %v1034_v48 = vadd.f32 %v1032_v47, %v1024_v46 }
0x1544   :  { %1609 = vtanh.f32 %v1034_v48  ;;  %1048 = vrot.lane.b32.xlu0 %v1034_v48, %s1714_s5 }
0x1545   :  { %v380_v49 = vpop.permute.xlu0 %379 }
0x1546   :  { %383 = vst.msk [vmem:[#allocation2] sm:$0xc] %vm382_vm5, %v380_v49 }
0x1549   :  { %v604_v50 = vpop.permute.xlu0 %603 }
0x154a   :  { %607 = vst.msk [vmem:[#allocation2] sm:$0xc0] %vm606_vm6, %v604_v50 }
0x154d   :  { %v932_v53 = vpop.permute.xlu0 %931 }
0x154e   :  { %v1610_v34 = vpop.eup %1609  ;;  %934 = vst.msk [vmem:[#allocation2 + $0x8] sm:$0x30] %vm494_vm7, %v932_v53 }
0x154f   :  { %1037 = vrot.lane.b32.xlu1 %v1610_v34, %s1712_s20 }
0x1553   :  { %491 = vrot.lane.b32.xlu1 %v1892_v13, %s1713_s21  ;;  %v1056_v13 = vld [vmem:[%s2036_s6 + $0x10] sm:$0xff] }
0x1554   :  { %v1525_v57 = vpack.c.bf16 %v1057_v56, %v1056_v13 }
0x1556   :  { %1526 = vmatprep.subr.bf16.mxu1 %v1525_v57 }
0x1557   :  { %820 = vrot.lane.b32.xlu1 %v1933_v8, %s1713_s21  ;;  %1528 = vmatpush3.bf16.msra.mxu1 %v1525_v57 }
0x15b6   :  { %v1049_v55 = vpop.permute.xlu0 %1048 }
0x15b7   :  { %1051 = vst.msk [vmem:[#allocation9 - $0x6] sm:$0xc0] %vm606_vm6, %v1049_v55 }
0x15c1   :  { %v1038_v61 = vpop.permute.xlu1 %1037 }
0x15c2   :  { %v1040_v62 = vmul.f32 %v1608_v43, %v1038_v61 }
0x15c4   :  { %1042 = vrot.lane.b32.xlu1 %v1040_v62, %s1713_s21 }
0x15c5   :  { %v492_v5 = vpop.permute.xlu1 %491 }
0x15c6   :  { %495 = vst.msk [vmem:[#allocation2] sm:$0x30] %vm494_vm7, %v492_v5 }
0x15c9   :  { %v821_v63 = vpop.permute.xlu1 %820 }
0x15ca   :  { %823 = vst.msk [vmem:[#allocation2 + $0x8] sm:$0xc] %vm382_vm5, %v821_v63 }
0x15cd   :  { %v1052_v1 = vld [vmem:[#allocation2] sm:$0xff] }
0x15ce   :  { %1459 = vmatprep.mubr.msk.f32.mxu1 %vm166_vm3, %v1052_v1 }
0x1636   :  { %v1043_v2 = vpop.permute.xlu1 %1042 }
0x1637   :  { %1045 = vst.msk [vmem:[#allocation2 + $0x8] sm:$0xc0] %vm606_vm6, %v1043_v2  ;;  %1046 = vst.msk [vmem:[#allocation8 - $0x6] sm:$0xc0] %vm606_vm6, %v1043_v2 }
0x163e   :  { %v1053_v0 = vld [vmem:[#allocation2 + $0x8] sm:$0xff] }
0x163f   :  { %1460 = vmatmul.mubr.msk.f32.vlgmr.msra.gmra.mrb[8].mxu1 %vm166_vm3, %v1053_v0 }
0x1712   :  { %v1461_v7 = vpop.f32.mrb[8].mxu1 }
0x1713   :  { %v1143_v8 = vadd.f32 %v1461_v7, %v1297_v6  ;;  %v1137_v9 = vpop.f32.mrb[9].mxu1 }
0x1714   :  { %v1138_v11 = vadd.f32 %v1297_v6, %v1137_v9 }
0x1715   :  { %v1147_v15 = vmax.f32 %v1143_v8, 0.0 }
0x1716   :  { %v1146_v12 = vmax.f32 %v1138_v11, 0.0 }
0x1718   :  { %1470 = vmatprep.mubr.msk.f32.mxu0 %vm166_vm3, %v1146_v12 }
0x1719   :  { %1471 = vmatmul.mubr.msk.f32.vlgmr.msra.gmra.mrb[10].mxu0 %vm166_vm3, %v1147_v15 }
0x171a   :  { %1666 = shalt.err (!%p1663_p6)
}
0x171b   :  { %s1667_s21 = scalar_lea.hbm %s2041_s11, 32 }
0x171c   :  { %p1668_p7 = scmp.ne.s32.totalorder %s2041_s11, %s1667_s21  ;;  %p1671_p8 = scmp.lt.u32.totalorder %s1667_s21, %s2041_s11 }
0x171e   :  { %p1673_p9 = pnand %p1671_p8, %p1668_p7 }
0x1720   :  { %1676 = shalt.err (!%p1673_p9)
}
0x1721   :  { %1254 = dma.vmem_to_hbm [thread:$0]  %s1252_s4, 32, %s2041_s11, [#allocation5]  }
0x1722   :  { %s1677_s27 = scalar_lea.vmem %s1262_s1, 32  ;;  %p1682_p11 = scmp.lt.s32.totalorder %s1262_s1, %s1262_s1 }
0x1723   :  { %p1678_p10 = scmp.ne.s32.totalorder %s1262_s1, %s1677_s27  ;;  %p1683_p12 = scmp.lt.s32.totalorder %s1677_s27, %s1677_s27 }
0x1725   :  { %p1684_p13 = por %p1683_p12, %p1682_p11 }
0x1727   :  { %p1685_p0 = pnand %p1684_p13, %p1678_p10 }
0x1729   :  { %1688 = shalt.err (!%p1685_p0)
}
0x172a   :  { %s1689_s3 = scalar_lea.hbm %s2042_s12, 32 }
0x172b   :  { %p1690_p1 = scmp.ne.s32.totalorder %s2042_s12, %s1689_s3  ;;  %p1693_p2 = scmp.lt.u32.totalorder %s1689_s3, %s2042_s12 }
0x172d   :  { %p1695_p3 = pnand %p1693_p2, %p1690_p1 }
0x172f   :  { %1698 = shalt.err (!%p1695_p3)
}
0x1730   :  { %1264 = dma.vmem_to_hbm [thread:$0]  %s1262_s1, 32, %s2042_s12, [#allocation10]   ;;  %v1300_v17 = vld [vmem:[%s2039_s9] ss:$0 sm:$0xff]  ;;  %vm1240_vm8 = vcmask 48128  }
0x17ec   :  { %v1472_v18 = vpop.f32.mrb[10].mxu0 }
0x17ed   :  { %v1237_v19 = vadd.f32 %v1472_v18, %v1300_v17  ;;  %v1231_v20 = vpop.f32.mrb[11].mxu0 }
0x17ee   :  { %v1232_v21 = vadd.f32 %v1300_v17, %v1231_v20 }
0x17ef   :  { %1242 = vst.msk [vmem:[%s2040_s10 + $0x8] sm:$0xff] %vm1240_vm8, %v1237_v19 }
0x17f0   :  { %1241 = vst.msk [vmem:[%s2040_s10] sm:$0xff] %vm1240_vm8, %v1232_v21 }
0x17f1   :  { %1703 = dma.done.wait [#allocation5], 32  }
0x17f2   :  { %1704 = vsyncadd [#allocation5], 4294967264 }
0x17f3   :  { %1705 = dma.done.wait [#allocation10], 32  }
0x17f4   :  { %1706 = vsyncadd [#allocation10], 4294967264 }
0x17f5   :  { %1273 = vsyncpa [#allocation4], 1 }
0x17f6   :  { %1274 = vsyncpa [#allocation7], 1 }
0x17f7   :  { %1275 = vsyncpa [#allocation5], 1 }
0x17f8   :  { %1276 = vsyncpa [#allocation10], 1 }

</bundles_post_ra>
